<compile_context>
chip_gen: v5e
topology: v5e:2x2
jax: 0.10.0
libtpu: 0.0.40
codegen_flags: <defaults>
</compile_context>

<pallas_src>
import functools

import jax
import jax.numpy as jnp
from jax.experimental import pallas as pl
from jax.experimental.pallas import tpu as pltpu


_NEG_BIG = -1e30  # acts like -inf, but exp(_NEG_BIG - finite) == 0 with no NaN risk


# ----------------------------- fused Pallas kernel --------------------------

def _gat_fused_kernel(tgt_ref, src_ref, x_ref, w_ref, att_ref,   # inputs
                      o_ref,                                      # output
                      h_ref, p_ref, acc_ref, m_ref, l_ref,        # scratch
                      *, negative_slope, num_edges):
    k = pl.program_id(0)
    n_pad = h_ref.shape[0]
    edge_tile = tgt_ref.shape[1]

    # ---- one-time setup: h = x @ W and per-node attention projections -----
    @pl.when(k == 0)
    def _init():
        # Fused linear transform; h stays VMEM-resident for the whole sweep.
        h_ref[...] = jnp.dot(x_ref[...], w_ref[...],
                             preferred_element_type=jnp.float32)
        # p[0, n] = <h[n], att_i>,  p[1, n] = <h[n], att_j>   (rows 2..7 zero)
        p_ref[...] = jax.lax.dot_general(
            att_ref[...], h_ref[...], (((1,), (1,)), ((), ())),
            preferred_element_type=jnp.float32)
        acc_ref[...] = jnp.zeros_like(acc_ref)
        m_ref[...] = jnp.full_like(m_ref, _NEG_BIG)
        l_ref[...] = jnp.zeros_like(l_ref)

    h = h_ref[...]                                    # [N_pad, C_pad]
    tgt = tgt_ref[...]                                # [1, tE]  edges on lanes
    src = src_ref[...]                                # [tE, 1]  edges on sublanes

    # ---- one-hot incidence tiles, built in-register (never touch HBM) -----
    node_row = jax.lax.broadcasted_iota(jnp.int32, (n_pad, edge_tile), 0)
    oh_tgt = (node_row == tgt).astype(jnp.float32)    # [N_pad, tE]  scatter tile
    node_col = jax.lax.broadcasted_iota(jnp.int32, (edge_tile, n_pad), 1)
    oh_src = (node_col == src).astype(jnp.float32)    # [tE, N_pad]  gather tile

    # ---- edge scores, lane-dense [1, tE] -----------------------------------
    # s_i[e] = p_i[tgt[e]],  s_j[e] = p_j[src[e]]  -- both as MXU matmuls.
    s_i = jnp.dot(p_ref[...], oh_tgt,
                  preferred_element_type=jnp.float32)[0:1, :]
    s_j = jax.lax.dot_general(p_ref[...], oh_src, (((1,), (1,)), ((), ())),
                              preferred_element_type=jnp.float32)[1:2, :]
    s = s_i + s_j
    s = jnp.where(s > 0, s, negative_slope * s)       # leaky_relu

    lane = jax.lax.broadcasted_iota(jnp.int32, (1, edge_tile), 1)
    valid = (k * edge_tile + lane) < num_edges        # mask padded edge lanes

    # ---- online softmax over ALL edges (== F.softmax(alpha, dim=0)) --------
    m_prev = m_ref[...]                                             # [1, 1]
    m_tile = jnp.max(jnp.where(valid, s, _NEG_BIG), axis=1, keepdims=True)
    m_new = jnp.maximum(m_prev, m_tile)
    scale = jnp.exp(m_prev - m_new)                                 # [1, 1]
    e = jnp.where(valid, jnp.exp(s - m_new), 0.0)                   # [1, tE]
    l_ref[...] = l_ref[...] * scale + jnp.sum(e, axis=1, keepdims=True)
    m_ref[...] = m_new

    # ---- gather x_j rows and scatter-add exp-weighted rows (both on MXU) ---
    x_j = jnp.dot(oh_src, h, preferred_element_type=jnp.float32)    # [tE, C_pad]
    acc_ref[...] = acc_ref[...] * scale + jnp.dot(
        oh_tgt * e, x_j, preferred_element_type=jnp.float32)        # [N_pad, C_pad]

    # ---- finalize: normalize by the global softmax denominator -------------
    @pl.when(k == pl.num_programs(0) - 1)
    def _finalize():
        inv_l = pl.reciprocal(l_ref[...], approx=True)              # EUP slot
        o_ref[...] = (acc_ref[...] * inv_l).astype(o_ref.dtype)


# ------------------------------- JAX wrapper --------------------------------

def _round_up(v, m):
    return (v + m - 1) // m * m


def gat_conv_forward(x, edge_index, weight, att, *, heads=1, out_channels=None,
                     negative_slope=0.2, concat=True, edge_tile=512):
    assert heads == 1, "original PyTorch broadcast only supports heads == 1"
    n, f_in = x.shape
    hc = heads * (out_channels if out_channels is not None
                  else weight.shape[1] // heads)
    num_e = edge_index.shape[1]

    LANE, SUB = 128, 8
    n_pad = _round_up(n, SUB)
    f_pad = _round_up(f_in, LANE)
    c_pad = _round_up(hc, LANE)
    te = min(_round_up(edge_tile, LANE), _round_up(num_e, LANE))
    e_pad = _round_up(num_e, te)
    n_tiles = e_pad // te

    # Zero-pad everything to lane/sublane friendly shapes. Padding is inert:
    # padded x columns hit zero W rows, padded nodes are never referenced by a
    # real edge, padded edges point at node `n_pad` (matches no one-hot row)
    # and are additionally masked in-kernel for the softmax statistics.
    f32 = jnp.float32
    x_pad = jnp.zeros((n_pad, f_pad), f32).at[:n, :f_in].set(x.astype(f32))
    w_pad = jnp.zeros((f_pad, c_pad), f32).at[:f_in, :hc].set(weight.astype(f32))
    att_flat = att.reshape(-1).astype(f32)                         # [2 * hc]
    att8 = (jnp.zeros((8, c_pad), f32)
            .at[0, :hc].set(att_flat[:hc])                          # att_i
            .at[1, :hc].set(att_flat[hc:]))                         # att_j

    # Edge endpoints, in the two layouts the kernel consumes:
    #   tgt: [1, E_pad]  (edges on the lane axis   -> scatter one-hot / scores)
    #   src: [E_pad, 1]  (edges on the sublane axis -> gather one-hot)
    tgt = (jnp.full((1, e_pad), n_pad, jnp.int32)
           .at[0, :num_e].set(edge_index[0].astype(jnp.int32)))
    src = (jnp.full((e_pad, 1), n_pad, jnp.int32)
           .at[:num_e, 0].set(edge_index[1].astype(jnp.int32)))

    grid_spec = pltpu.PrefetchScalarGridSpec(
        num_scalar_prefetch=0,
        grid=(n_tiles,),
        in_specs=[
            pl.BlockSpec((1, te), lambda k: (0, k)),            # tgt tile
            pl.BlockSpec((te, 1), lambda k: (k, 0)),            # src tile
            pl.BlockSpec((n_pad, f_pad), lambda k: (0, 0)),     # x   (resident)
            pl.BlockSpec((f_pad, c_pad), lambda k: (0, 0)),     # W   (resident)
            pl.BlockSpec((8, c_pad), lambda k: (0, 0)),         # att (resident)
        ],
        out_specs=pl.BlockSpec((n_pad, c_pad), lambda k: (0, 0)),
        scratch_shapes=[
            pltpu.VMEM((n_pad, c_pad), f32),    # h = x @ W
            pltpu.VMEM((8, n_pad), f32),        # per-node attention projections
            pltpu.VMEM((n_pad, c_pad), f32),    # output accumulator
            pltpu.VMEM((1, 1), f32),            # running softmax max
            pltpu.VMEM((1, 1), f32),            # running softmax sum
        ],
    )

    out_pad = pl.pallas_call(
        functools.partial(_gat_fused_kernel,
                          negative_slope=negative_slope, num_edges=num_e),
        grid_spec=grid_spec,
        out_shape=jax.ShapeDtypeStruct((n_pad, c_pad), f32),
        compiler_params=pltpu.CompilerParams(
            dimension_semantics=("arbitrary",),   # edge axis is a reduction
            vmem_limit_bytes=32 * 1024 * 1024),
    )(tgt, src, x_pad, w_pad, att8)

    out = out_pad[:n, :hc]
    if concat:
        return out
    return out.reshape(n, heads, hc // heads).mean(axis=1)


# -------------------------- pure-JAX reference ------------------------------

def gat_conv_reference(x, edge_index, weight, att, *, heads=1,
                       out_channels=None, negative_slope=0.2):
    n = x.shape[0]
    c = out_channels
    h = x @ weight
    x_i = h[edge_index[0]]
    x_j = h[edge_index[1]]
    a = att.reshape(1, 2 * c)
    score = (x_i * a[:, :c]).sum(-1) + (x_j * a[:, c:]).sum(-1)
    score = jnp.where(score > 0, score, negative_slope * score)
    alpha = jax.nn.softmax(score, axis=0)                     # over all edges
    weighted = alpha[:, None] * x_j
    return jnp.zeros((n, c), jnp.float32).at[edge_index[0]].add(weighted)


# --------------------------------- __main__ ---------------------------------

if __name__ == "__main__":
    key = jax.random.PRNGKey(0)
    k_x, k_e, k_w, k_a = jax.random.split(key, 4)

    in_channels, out_channels, heads = 8, 8, 1
    num_nodes, num_edges = 16, 32

    # Deterministic xavier_uniform-style parameter init.
    w_bound = (6.0 / (in_channels + heads * out_channels)) ** 0.5
    weight = jax.random.uniform(k_w, (in_channels, heads * out_channels),
                                jnp.float32, -w_bound, w_bound)
    a_bound = (6.0 / (heads * 2 * out_channels + 2 * out_channels)) ** 0.5
    att = jax.random.uniform(k_a, (1, heads, 2 * out_channels),
                             jnp.float32, -a_bound, a_bound)

    x = jax.random.normal(k_x, (num_nodes, in_channels), jnp.float32)
    edge_index = jax.random.randint(k_e, (2, num_edges), 0, num_nodes,
                                    dtype=jnp.int32)

    out = gat_conv_forward(x, edge_index, weight, att,
                           heads=heads, out_channels=out_channels,
                           negative_slope=0.2, concat=True)
    out = jax.block_until_ready(out)

    ref = gat_conv_reference(x, edge_index, weight, att,
                             heads=heads, out_channels=out_channels,
                             negative_slope=0.2)
    assert out.shape == (num_nodes, heads * out_channels)
    # Tolerance accounts for the approximate (EUP) reciprocal used for the
    # softmax denominator; everything else is f32-exact to ~1e-6.
    assert jnp.allclose(out, ref, atol=1e-3, rtol=1e-3)

    print("KERNEL_OK")
</pallas_src>

<mosaic_0001>
module attributes {stable_mosaic.version = 11 : i64} {
  func.func @_gat_fused_kernel(%arg0: i32, %arg1: memref<1x128xi32, #tpu.memory_space<vmem>>, %arg2: memref<128x1xi32, #tpu.memory_space<vmem>>, %arg3: memref<16x128xf32, #tpu.memory_space<vmem>>, %arg4: memref<128x128xf32, #tpu.memory_space<vmem>>, %arg5: memref<8x128xf32, #tpu.memory_space<vmem>>, %arg6: memref<16x128xf32, #tpu.memory_space<vmem>>, %arg7: memref<16x128xf32, #tpu.memory_space<vmem>>, %arg8: memref<8x16xf32, #tpu.memory_space<vmem>>, %arg9: memref<16x128xf32, #tpu.memory_space<vmem>>, %arg10: memref<1x1xf32, #tpu.memory_space<vmem>>, %arg11: memref<1x1xf32, #tpu.memory_space<vmem>>) attributes {dimension_semantics = [#tpu.dimension_semantics<arbitrary>], iteration_bounds = array<i64: 1>, scalar_prefetch = 0 : i64, scratch_operands = 5 : i64, tpu.core_type = #tpu.core_type<tc>, window_params = [{transform_indices = @transform_0, window_bounds = array<i64: 1, 128>}, {transform_indices = @transform_1, window_bounds = array<i64: 128, 1>}, {pipeline_mode = #tpu.pipeline_mode<synchronous>, transform_indices = @transform_2, window_bounds = array<i64: 16, 128>}, {pipeline_mode = #tpu.pipeline_mode<synchronous>, transform_indices = @transform_3, window_bounds = array<i64: 128, 128>}, {pipeline_mode = #tpu.pipeline_mode<synchronous>, transform_indices = @transform_4, window_bounds = array<i64: 8, 128>}, {pipeline_mode = #tpu.pipeline_mode<synchronous>, transform_indices = @transform_5, window_bounds = array<i64: 16, 128>}]} {
    %c0_i32 = arith.constant 0 : i32
    %0 = arith.cmpi eq, %arg0, %c0_i32 : i32
    %1 = arith.extui %0 : i1 to i32
    %c0_i32_0 = arith.constant 0 : i32
    %2 = arith.cmpi ne, %1, %c0_i32_0 : i32
    scf.if %2 {
      %c0_33 = arith.constant 0 : index
      %c0_34 = arith.constant 0 : index
      %66 = vector.load %arg3[%c0_33, %c0_34] : memref<16x128xf32, #tpu.memory_space<vmem>>, vector<16x128xf32>
      %c0_35 = arith.constant 0 : index
      %c0_36 = arith.constant 0 : index
      %67 = vector.load %arg4[%c0_35, %c0_36] : memref<128x128xf32, #tpu.memory_space<vmem>>, vector<128x128xf32>
      %cst_37 = arith.constant dense<0.000000e+00> : vector<16x128xf32>
      %68 = tpu.matmul %66, %67, %cst_37 {dimension_numbers = #tpu.dot_dimension_numbers<[1], [0], [0], [1], [0, 0, 1, 1], [], []>} : vector<16x128xf32>, vector<128x128xf32>, vector<16x128xf32> -> vector<16x128xf32>
      %c0_38 = arith.constant 0 : index
      %c0_39 = arith.constant 0 : index
      %69 = vector.load %arg7[%c0_38, %c0_39] : memref<16x128xf32, #tpu.memory_space<vmem>>, vector<16x128xf32>
      tpu.vector_store %arg7[%c0_38, %c0_39], %68 {strides = array<i32>} : memref<16x128xf32, #tpu.memory_space<vmem>>, vector<16x128xf32>,
      %c0_40 = arith.constant 0 : index
      %c0_41 = arith.constant 0 : index
      %70 = vector.load %arg5[%c0_40, %c0_41] : memref<8x128xf32, #tpu.memory_space<vmem>>, vector<8x128xf32>
      %c0_42 = arith.constant 0 : index
      %c0_43 = arith.constant 0 : index
      %71 = vector.load %arg7[%c0_42, %c0_43] : memref<16x128xf32, #tpu.memory_space<vmem>>, vector<16x128xf32>
      %cst_44 = arith.constant dense<0.000000e+00> : vector<8x16xf32>
      %72 = tpu.matmul %70, %71, %cst_44 {dimension_numbers = #tpu.dot_dimension_numbers<[1], [1], [0], [0], [0, 0, 1, 0], [], []>} : vector<8x128xf32>, vector<16x128xf32>, vector<8x16xf32> -> vector<8x16xf32>
      %c0_45 = arith.constant 0 : index
      %c0_46 = arith.constant 0 : index
      %73 = vector.load %arg8[%c0_45, %c0_46] : memref<8x16xf32, #tpu.memory_space<vmem>>, vector<8x16xf32>
      tpu.vector_store %arg8[%c0_45, %c0_46], %72 {strides = array<i32>} : memref<8x16xf32, #tpu.memory_space<vmem>>, vector<8x16xf32>,
      %cst_47 = arith.constant 0.000000e+00 : f32
      %74 = vector.broadcast %cst_47 : f32 to vector<16x128xf32>
      %c0_48 = arith.constant 0 : index
      %c0_49 = arith.constant 0 : index
      %75 = vector.load %arg9[%c0_48, %c0_49] : memref<16x128xf32, #tpu.memory_space<vmem>>, vector<16x128xf32>
      tpu.vector_store %arg9[%c0_48, %c0_49], %74 {strides = array<i32>} : memref<16x128xf32, #tpu.memory_space<vmem>>, vector<16x128xf32>,
      %cst_50 = arith.constant -1.000000e+30 : f32
      %76 = vector.broadcast %cst_50 : f32 to vector<1x1xf32>
      %c0_51 = arith.constant 0 : index
      %c0_52 = arith.constant 0 : index
      %77 = vector.load %arg10[%c0_51, %c0_52] : memref<1x1xf32, #tpu.memory_space<vmem>>, vector<1x1xf32>
      tpu.vector_store %arg10[%c0_51, %c0_52], %76 {strides = array<i32>} : memref<1x1xf32, #tpu.memory_space<vmem>>, vector<1x1xf32>,
      %cst_53 = arith.constant 0.000000e+00 : f32
      %78 = vector.broadcast %cst_53 : f32 to vector<1x1xf32>
      %c0_54 = arith.constant 0 : index
      %c0_55 = arith.constant 0 : index
      %79 = vector.load %arg11[%c0_54, %c0_55] : memref<1x1xf32, #tpu.memory_space<vmem>>, vector<1x1xf32>
      tpu.vector_store %arg11[%c0_54, %c0_55], %78 {strides = array<i32>} : memref<1x1xf32, #tpu.memory_space<vmem>>, vector<1x1xf32>,
    } else {
    }
    %c0 = arith.constant 0 : index
    %c0_1 = arith.constant 0 : index
    %3 = vector.load %arg7[%c0, %c0_1] : memref<16x128xf32, #tpu.memory_space<vmem>>, vector<16x128xf32>
    %c0_2 = arith.constant 0 : index
    %c0_3 = arith.constant 0 : index
    %4 = vector.load %arg1[%c0_2, %c0_3] : memref<1x128xi32, #tpu.memory_space<vmem>>, vector<1x128xi32>
    %c0_4 = arith.constant 0 : index
    %c0_5 = arith.constant 0 : index
    %5 = vector.load %arg2[%c0_4, %c0_5] : memref<128x1xi32, #tpu.memory_space<vmem>>, vector<128x1xi32>
    %6 = tpu.iota {dimensions = array<i32: 0>} : vector<16x128xi32>
    %7 = vector.broadcast %4 : vector<1x128xi32> to vector<16x128xi32>
    %8 = arith.cmpi eq, %6, %7 : vector<16x128xi32>
    %9 = arith.extui %8 : vector<16x128xi1> to vector<16x128xi32>
    %10 = arith.sitofp %9 : vector<16x128xi32> to vector<16x128xf32>
    %11 = tpu.iota {dimensions = array<i32: 1>} : vector<128x16xi32>
    %12 = vector.broadcast %5 : vector<128x1xi32> to vector<128x16xi32>
    %13 = arith.cmpi eq, %11, %12 : vector<128x16xi32>
    %14 = arith.extui %13 : vector<128x16xi1> to vector<128x16xi32>
    %15 = arith.sitofp %14 : vector<128x16xi32> to vector<128x16xf32>
    %c0_6 = arith.constant 0 : index
    %c0_7 = arith.constant 0 : index
    %16 = vector.load %arg8[%c0_6, %c0_7] : memref<8x16xf32, #tpu.memory_space<vmem>>, vector<8x16xf32>
    %cst = arith.constant dense<0.000000e+00> : vector<8x128xf32>
    %17 = tpu.matmul %16, %10, %cst {dimension_numbers = #tpu.dot_dimension_numbers<[1], [0], [0], [1], [0, 0, 1, 1], [], []>} : vector<8x16xf32>, vector<16x128xf32>, vector<8x128xf32> -> vector<8x128xf32>
    %18 = vector.extract_strided_slice %17 {offsets = [0, 0], sizes = [1, 128], strides = [1, 1]} : vector<8x128xf32> to vector<1x128xf32>
    %c0_8 = arith.constant 0 : index
    %c0_9 = arith.constant 0 : index
    %19 = vector.load %arg8[%c0_8, %c0_9] : memref<8x16xf32, #tpu.memory_space<vmem>>, vector<8x16xf32>
    %cst_10 = arith.constant dense<0.000000e+00> : vector<8x128xf32>
    %20 = tpu.matmul %19, %15, %cst_10 {dimension_numbers = #tpu.dot_dimension_numbers<[1], [1], [0], [0], [0, 0, 1, 0], [], []>} : vector<8x16xf32>, vector<128x16xf32>, vector<8x128xf32> -> vector<8x128xf32>
    %21 = vector.extract_strided_slice %20 {offsets = [1, 0], sizes = [1, 128], strides = [1, 1]} : vector<8x128xf32> to vector<1x128xf32>
    %22 = arith.addf %18, %21 : vector<1x128xf32>
    %cst_11 = arith.constant 0.000000e+00 : f32
    %23 = vector.broadcast %cst_11 : f32 to vector<1x128xf32>
    %24 = arith.cmpf ogt, %22, %23 : vector<1x128xf32>
    %cst_12 = arith.constant 2.000000e-01 : f32
    %25 = vector.broadcast %cst_12 : f32 to vector<1x128xf32>
    %26 = arith.mulf %25, %22 : vector<1x128xf32>
    %27 = arith.select %24, %22, %26 : vector<1x128xi1>, vector<1x128xf32>
    %28 = tpu.iota {dimensions = array<i32: 1>} : vector<1x128xi32>
    %c128_i32 = arith.constant 128 : i32
    %29 = arith.muli %arg0, %c128_i32 : i32
    %30 = vector.broadcast %29 : i32 to vector<1x128xi32>
    %31 = arith.addi %30, %28 : vector<1x128xi32>
    %c32_i32 = arith.constant 32 : i32
    %32 = vector.broadcast %c32_i32 : i32 to vector<1x128xi32>
    %33 = arith.cmpi slt, %31, %32 : vector<1x128xi32>
    %c0_13 = arith.constant 0 : index
    %c0_14 = arith.constant 0 : index
    %34 = vector.load %arg10[%c0_13, %c0_14] : memref<1x1xf32, #tpu.memory_space<vmem>>, vector<1x1xf32>
    %cst_15 = arith.constant -1.000000e+30 : f32
    %35 = vector.broadcast %cst_15 : f32 to vector<1x128xf32>
    %36 = arith.select %33, %27, %35 : vector<1x128xi1>, vector<1x128xf32>
    %cst_16 = arith.constant dense<0xFF800000> : vector<1xf32>
    %37 = vector.multi_reduction <maximumf>, %36, %cst_16 [1] : vector<1x128xf32> to vector<1xf32>
    %38 = vector.shape_cast %37 : vector<1xf32> to vector<1x1xf32>
    %39 = arith.maximumf %34, %38 : vector<1x1xf32>
    %40 = arith.subf %34, %39 : vector<1x1xf32>
    %41 = math.exp %40 : vector<1x1xf32>
    %42 = vector.broadcast %39 : vector<1x1xf32> to vector<1x128xf32>
    %43 = arith.subf %27, %42 : vector<1x128xf32>
    %44 = math.exp %43 : vector<1x128xf32>
    %cst_17 = arith.constant 0.000000e+00 : f32
    %45 = vector.broadcast %cst_17 : f32 to vector<1x128xf32>
    %46 = arith.select %33, %44, %45 : vector<1x128xi1>, vector<1x128xf32>
    %c0_18 = arith.constant 0 : index
    %c0_19 = arith.constant 0 : index
    %47 = vector.load %arg11[%c0_18, %c0_19] : memref<1x1xf32, #tpu.memory_space<vmem>>, vector<1x1xf32>
    %48 = arith.mulf %47, %41 : vector<1x1xf32>
    %cst_20 = arith.constant dense<0.000000e+00> : vector<1xf32>
    %49 = vector.multi_reduction <add>, %46, %cst_20 [1] : vector<1x128xf32> to vector<1xf32>
    %50 = vector.shape_cast %49 : vector<1xf32> to vector<1x1xf32>
    %51 = arith.addf %48, %50 : vector<1x1xf32>
    %c0_21 = arith.constant 0 : index
    %c0_22 = arith.constant 0 : index
    %52 = vector.load %arg11[%c0_21, %c0_22] : memref<1x1xf32, #tpu.memory_space<vmem>>, vector<1x1xf32>
    tpu.vector_store %arg11[%c0_21, %c0_22], %51 {strides = array<i32>} : memref<1x1xf32, #tpu.memory_space<vmem>>, vector<1x1xf32>,
    %c0_23 = arith.constant 0 : index
    %c0_24 = arith.constant 0 : index
    %53 = vector.load %arg10[%c0_23, %c0_24] : memref<1x1xf32, #tpu.memory_space<vmem>>, vector<1x1xf32>
    tpu.vector_store %arg10[%c0_23, %c0_24], %39 {strides = array<i32>} : memref<1x1xf32, #tpu.memory_space<vmem>>, vector<1x1xf32>,
    %cst_25 = arith.constant dense<0.000000e+00> : vector<128x128xf32>
    %54 = tpu.matmul %15, %3, %cst_25 {dimension_numbers = #tpu.dot_dimension_numbers<[1], [0], [0], [1], [0, 0, 1, 1], [], []>} : vector<128x16xf32>, vector<16x128xf32>, vector<128x128xf32> -> vector<128x128xf32>
    %c0_26 = arith.constant 0 : index
    %c0_27 = arith.constant 0 : index
    %55 = vector.load %arg9[%c0_26, %c0_27] : memref<16x128xf32, #tpu.memory_space<vmem>>, vector<16x128xf32>
    %56 = vector.broadcast %41 : vector<1x1xf32> to vector<16x128xf32>
    %57 = arith.mulf %55, %56 : vector<16x128xf32>
    %58 = vector.broadcast %46 : vector<1x128xf32> to vector<16x128xf32>
    %59 = arith.mulf %10, %58 : vector<16x128xf32>
    %cst_28 = arith.constant dense<0.000000e+00> : vector<16x128xf32>
    %60 = tpu.matmul %59, %54, %cst_28 {dimension_numbers = #tpu.dot_dimension_numbers<[1], [0], [0], [1], [0, 0, 1, 1], [], []>} : vector<16x128xf32>, vector<128x128xf32>, vector<16x128xf32> -> vector<16x128xf32>
    %61 = arith.addf %57, %60 : vector<16x128xf32>
    %c0_29 = arith.constant 0 : index
    %c0_30 = arith.constant 0 : index
    %62 = vector.load %arg9[%c0_29, %c0_30] : memref<16x128xf32, #tpu.memory_space<vmem>>, vector<16x128xf32>
    tpu.vector_store %arg9[%c0_29, %c0_30], %61 {strides = array<i32>} : memref<16x128xf32, #tpu.memory_space<vmem>>, vector<16x128xf32>,
    %c0_i32_31 = arith.constant 0 : i32
    %63 = arith.cmpi eq, %arg0, %c0_i32_31 : i32
    %64 = arith.extui %63 : i1 to i32
    %c0_i32_32 = arith.constant 0 : i32
    %65 = arith.cmpi ne, %64, %c0_i32_32 : i32
    scf.if %65 {
      %c0_33 = arith.constant 0 : index
      %c0_34 = arith.constant 0 : index
      %66 = vector.load %arg11[%c0_33, %c0_34] : memref<1x1xf32, #tpu.memory_space<vmem>>, vector<1x1xf32>
      %67 = tpu.reciprocal %66 {approx = true} : vector<1x1xf32> -> vector<1x1xf32>
      %c0_35 = arith.constant 0 : index
      %c0_36 = arith.constant 0 : index
      %68 = vector.load %arg9[%c0_35, %c0_36] : memref<16x128xf32, #tpu.memory_space<vmem>>, vector<16x128xf32>
      %69 = vector.broadcast %67 : vector<1x1xf32> to vector<16x128xf32>
      %70 = arith.mulf %68, %69 : vector<16x128xf32>
      %c0_37 = arith.constant 0 : index
      %c0_38 = arith.constant 0 : index
      %71 = vector.load %arg6[%c0_37, %c0_38] : memref<16x128xf32, #tpu.memory_space<vmem>>, vector<16x128xf32>
      tpu.vector_store %arg6[%c0_37, %c0_38], %70 {strides = array<i32>} : memref<16x128xf32, #tpu.memory_space<vmem>>, vector<16x128xf32>,
    } else {
    }
    return
  }
  func.func @transform_0(%arg0: i32) -> (i32, i32) {
    %c0_i32 = arith.constant 0 : i32
    %c0_i32_0 = arith.constant 0 : i32
    return %c0_i32, %arg0 : i32, i32
  }
  func.func @transform_1(%arg0: i32) -> (i32, i32) {
    %c0_i32 = arith.constant 0 : i32
    %c0_i32_0 = arith.constant 0 : i32
    return %arg0, %c0_i32 : i32, i32
  }
  func.func @transform_2(%arg0: i32) -> (i32, i32) {
    %c0_i32 = arith.constant 0 : i32
    %c0_i32_0 = arith.constant 0 : i32
    %c0_i32_1 = arith.constant 0 : i32
    return %c0_i32, %c0_i32_0 : i32, i32
  }
  func.func @transform_3(%arg0: i32) -> (i32, i32) {
    %c0_i32 = arith.constant 0 : i32
    %c0_i32_0 = arith.constant 0 : i32
    %c0_i32_1 = arith.constant 0 : i32
    return %c0_i32, %c0_i32_0 : i32, i32
  }
  func.func @transform_4(%arg0: i32) -> (i32, i32) {
    %c0_i32 = arith.constant 0 : i32
    %c0_i32_0 = arith.constant 0 : i32
    %c0_i32_1 = arith.constant 0 : i32
    return %c0_i32, %c0_i32_0 : i32, i32
  }
  func.func @transform_5(%arg0: i32) -> (i32, i32) {
    %c0_i32 = arith.constant 0 : i32
    %c0_i32_0 = arith.constant 0 : i32
    %c0_i32_1 = arith.constant 0 : i32
    return %c0_i32, %c0_i32_0 : i32, i32
  }
}

</mosaic_0001>

<bundles_post_ra>
// kernel: tpu_custom_call.1
= control target key start
LH: loop header
LB: loop body
LE: loop exit
PB: predicated region body
PF: predicated region fallthrough
CT: control target
= control target key end

     0   :  { %10 = vsyncpa [#allocation8], 0  ;;  %s964_s0 = inlined_call_operand.vmem [shape: s32[1,128], index: 0, kind: input, shape index: {}]   ;;  %s965_s1 = inlined_call_operand.vmem [shape: s32[128,1], index: 1, kind: input, shape index: {}]   ;;  %s966_s2 = inlined_call_operand.hbm [shape: f32[16,128], index: 2, kind: input, shape index: {}]   ;;  %s967_s3 = inlined_call_operand.vmem [shape: f32[128,128], index: 3, kind: input, shape index: {}]   ;;  %s968_s4 = inlined_call_operand.hbm [shape: f32[8,128], index: 4, kind: input, shape index: {}]   ;;  %s969_s5 = inlined_call_operand.hbm [shape: f32[16,128], index: 5, kind: output, shape index: {}]  }
   0x1   :  { %11 = vsyncpa [#allocation11], 0 }
   0x2   :  { %12 = vsyncpa [#allocation9], 0  ;;  %s21_s20 = sshll.u32 %s966_s2, 4  ;;  %s685_s21 = smov [#allocation7]   ;;  %s22_s20 = int_to_ptr.hbm [resolvable:$true] %s21_s20 }
   0x3   :  { %s23_s22 = sshll.u32 %s685_s21, 4  ;;  %s37_s25 = sshll.u32 %s968_s4, 4  ;;  %s24_s22 = int_to_ptr.vmem [resolvable:$true] %s23_s22  ;;  %s38_s25 = int_to_ptr.hbm [resolvable:$true] %s37_s25 }
   0x4   :  { %s686_s26 = smov 128   ;;  %s687_s27 = smov 8  }
   0x5   :  { %29 = dma.hbm_to_vmem [thread:$0]  %s22_s20, 256, %s24_s22, [#allocation8], %s686_s26, %s686_s26, %s687_s27  }
   0x6   :  { %s688_s28 = smov [#allocation10]  }
   0x7   :  { %s39_s29 = sshll.u32 %s688_s28, 4  ;;  %s40_s29 = int_to_ptr.vmem [resolvable:$true] %s39_s29 }
   0x8   :  { %42 = dma.hbm_to_vmem [thread:$0]  %s38_s25, 128, %s40_s29, [#allocation11]  }
   0x9   :  { %679 = dma.done.wait [#allocation8], 256  }
   0xa   :  { %680 = vsyncadd [#allocation8], 4294967040 }
   0xb   :  { %681 = dma.done.wait [#allocation11], 128  }
   0xc   :  { %682 = vsyncadd [#allocation11], 4294967168  ;;  %v72_v0 = vld [vmem:[%s967_s3 + $0x78] sm:$0xff]  ;;  %v71_v1 = vld [vmem:[%s967_s3 + $0x70] sm:$0xff]  ;;  %v689_v8 = vmov 0   ;;  %v147_v38 = vlaneseq  ;;  %vm121_vm2 = vcmask 130048  }
   0xd   :  { %73 = vmatpush.msra.mxu0 %v72_v0  ;;  %v70_v2 = vld [vmem:[%s967_s3 + $0x68] sm:$0xff]  ;;  %v69_v3 = vld [vmem:[%s967_s3 + $0x60] sm:$0xff]  ;;  %v68_v4 = vld [vmem:[%s967_s3 + $0x58] sm:$0xff]  ;;  %598 = vset.pattern.permute.xlu1 %v689_v8  ;;  %v690_v43 = vmov 0.0   ;;  %v691_v0 = vmov 1.0   ;;  %s516_s20 = sshll.u32 %s969_s5, 4  ;;  %s517_s20 = int_to_ptr.hbm [resolvable:$true] %s516_s20 }
   0xe   :  { %v67_v5 = vld [vmem:[%s967_s3 + $0x50] sm:$0xff]  ;;  %v144_v6 = vld [vmem:[%s965_s1 + $0x68] sm:$0xff]  ;;  %v146_v7 = vld [vmem:[%s965_s1 + $0x78] sm:$0xff]  ;;  %597 = vset.pattern.permute.xlu0 %v689_v8  ;;  %599 = vset.pattern.permute.xlu2 %v689_v8  ;;  %v829_v40 = vand.u32 127, %v147_v38  ;;  %v854_v52 = vshrl.u32 %v147_v38, 7 }
   0xf   :  { %74 = vmatpush.msra.mxu0 %v71_v1  ;;  %v66_v9 = vld [vmem:[%s967_s3 + $0x48] sm:$0xff]  ;;  %199 = vperm.xlu1 %598, %v144_v6   ;;  %v142_v10 = vld [vmem:[%s965_s1 + $0x58] sm:$0xff]  ;;  %v65_v11 = vld [vmem:[%s967_s3 + $0x40] sm:$0xff] }
  0x10   :  { %205 = vperm.xlu0 %597, %v146_v7   ;;  %193 = vperm.xlu2 %599, %v142_v10   ;;  %v64_v12 = vld [vmem:[%s967_s3 + $0x38] sm:$0xff]  ;;  %v143_v13 = vld [vmem:[%s965_s1 + $0x60] sm:$0xff]  ;;  %v63_v14 = vld [vmem:[%s967_s3 + $0x30] sm:$0xff]  ;;  %v863_v54 = vadd.s32 8, %v854_v52 }
  0x11   :  { %75 = vmatpush.msra.mxu0 %v70_v2  ;;  %v145_v15 = vld [vmem:[%s965_s1 + $0x70] sm:$0xff]  ;;  %v62_v16 = vld [vmem:[%s967_s3 + $0x28] sm:$0xff]  ;;  %v61_v18 = vld [vmem:[%s967_s3 + $0x20] sm:$0xff] }
  0x12   :  { %v141_v17 = vld [vmem:[%s965_s1 + $0x50] sm:$0xff]  ;;  %v60_v19 = vld [vmem:[%s967_s3 + $0x18] sm:$0xff]  ;;  %v139_v20 = vld [vmem:[%s965_s1 + $0x40] sm:$0xff] }
  0x13   :  { %76 = vmatpush.msra.mxu0 %v69_v3  ;;  %v59_v21 = vld [vmem:[%s967_s3 + $0x10] sm:$0xff]  ;;  %v140_v22 = vld [vmem:[%s965_s1 + $0x48] sm:$0xff]  ;;  %v138_v24 = vld [vmem:[%s965_s1 + $0x38] sm:$0xff] }
  0x14   :  { %v58_v23 = vld [vmem:[%s967_s3 + $0x8] sm:$0xff]  ;;  %v57_v25 = vld [vmem:[%s967_s3] sm:$0xff]  ;;  %v137_v28 = vld [vmem:[%s965_s1 + $0x30] sm:$0xff] }
  0x15   :  { %77 = vmatpush.msra.mxu0 %v68_v4  ;;  %v55_v26 = vld [vmem:[#allocation7] sm:$0xff]  ;;  %v135_v29 = vld [vmem:[%s965_s1 + $0x20] sm:$0xff]  ;;  %v56_v30 = vld [vmem:[#allocation7 + $0x8] sm:$0xff] }
  0x16   :  { %v136_v27 = vld [vmem:[%s965_s1 + $0x28] sm:$0xff]  ;;  %v133_v31 = vld [vmem:[%s965_s1 + $0x10] sm:$0xff]  ;;  %v134_v32 = vld [vmem:[%s965_s1 + $0x18] sm:$0xff] }
  0x17   :  { %78 = vmatpush.msra.mxu0 %v67_v5  ;;  %196 = vperm.xlu1 %598, %v143_v13   ;;  %v132_v33 = vld [vmem:[%s965_s1 + $0x8] sm:$0xff]  ;;  %v131_v34 = vld [vmem:[%s965_s1] sm:$0xff] }
  0x18   :  { %202 = vperm.xlu0 %597, %v145_v15   ;;  %190 = vperm.xlu2 %599, %v141_v17   ;;  %v868_v55 = vld [vmem:[%s964_s0] ss:$0 sm:$0xff]  ;;  %s693_s0 = smov [#allocation12]  }
  0x19   :  { %79 = vmatpush.msra.mxu0 %v66_v9  ;;  %vm152_vm9 = vcmp.eq.s32.totalorder %v863_v54, %v868_v55  ;;  %v98_v63 = vld [vmem:[#allocation10] sm:$0xff]  ;;  %vm151_vm11 = vcmp.eq.s32.totalorder %v854_v52, %v868_v55  ;;  %s514_s17 = sshll.u32 %s693_s0, 4  ;;  %s515_s17 = int_to_ptr.vmem [resolvable:$true] %s514_s17 }
  0x1b   :  { %80 = vmatpush.msra.mxu0 %v65_v11 }
  0x1d   :  { %81 = vmatpush.msra.mxu0 %v64_v12 }
  0x1f   :  { %82 = vmatpush.msra.mxu0 %v63_v14  ;;  %184 = vperm.xlu1 %598, %v139_v20  }
  0x20   :  { %187 = vperm.xlu0 %597, %v140_v22   ;;  %181 = vperm.xlu2 %599, %v138_v24  }
  0x21   :  { %83 = vmatpush.msra.mxu0 %v62_v16 }
  0x23   :  { %84 = vmatpush.msra.mxu0 %v61_v18 }
  0x25   :  { %85 = vmatpush.msra.mxu0 %v60_v19 }
  0x27   :  { %86 = vmatpush.msra.mxu0 %v59_v21  ;;  %175 = vperm.xlu1 %598, %v136_v27  }
  0x28   :  { %178 = vperm.xlu0 %597, %v137_v28   ;;  %172 = vperm.xlu2 %599, %v135_v29  }
  0x29   :  { %87 = vmatpush.msra.mxu0 %v58_v23 }
  0x2b   :  { %88 = vmatpush.msra.mxu0 %v57_v25 }
  0x2c   :  { %89 = vmatmul.f32.vlgmr.msra.gmra.mxu0 %v55_v26 }
  0x2f   :  { %166 = vperm.xlu1 %598, %v133_v31  }
  0x30   :  { %169 = vperm.xlu0 %597, %v134_v32   ;;  %163 = vperm.xlu2 %599, %v132_v33  }
  0x34   :  { %92 = vmatmul.f32.gmra.mxu0 %v56_v30  ;;  %v692_v30 = vmov -1e+30  }
  0x38   :  { %160 = vperm.xlu0 %597, %v131_v34  }
  0x6a   :  { %v194_v35 = vpop.permute.xlu2 %193 }
  0x6b   :  { %vm218_vm5 = vcmp.eq.s32.totalorder %v829_v40, %v194_v35 }
  0x6c   :  { %v859_v53 = vsel %vm218_vm5, 1.0, %v690_v43  ;;  %vm358_vm5 = vcmp.lt.s32.totalorder %v829_v40, 32 }
  0x72   :  { %v191_v39 = vpop.permute.xlu2 %190 }
  0x73   :  { %vm217_vm7 = vcmp.eq.s32.totalorder %v829_v40, %v191_v39 }
  0x74   :  { %v542_v61 = vsel %vm217_vm7, 1.0, %v690_v43 }
  0x7a   :  { %v182_v45 = vpop.permute.xlu2 %181 }
  0x7b   :  { %vm214_vm6 = vcmp.eq.s32.totalorder %v829_v40, %v182_v45 }
  0x7c   :  { %v539_v60 = vsel %vm214_vm6, 1.0, %v690_v43  ;;  %vm361_vm6 = vcmask 1040384  }
  0x81   :  { %v200_v37 = vpop.permute.xlu1 %199 }
  0x82   :  { %v206_v36 = vpop.permute.xlu0 %205  ;;  %vm220_vm3 = vcmp.eq.s32.totalorder %v829_v40, %v200_v37  ;;  %v173_v51 = vpop.permute.xlu2 %172 }
  0x83   :  { %vm222_vm0 = vcmp.eq.s32.totalorder %v829_v40, %v206_v36  ;;  %v845_v47 = vsel %vm220_vm3, 1.0, %v690_v43 }
  0x84   :  { %v834_v44 = vsel %vm222_vm0, 1.0, %v690_v43 }
  0x85   :  { %551 = vmatpush.xpose.msk.msra.mxu3 %vm121_vm2, %v834_v44 }
  0x89   :  { %v197_v42 = vpop.permute.xlu1 %196 }
  0x8a   :  { %v203_v41 = vpop.permute.xlu0 %202  ;;  %vm219_vm4 = vcmp.eq.s32.totalorder %v829_v40, %v197_v42  ;;  %v164_v59 = vpop.permute.xlu2 %163 }
  0x8b   :  { %vm221_vm1 = vcmp.eq.s32.totalorder %v829_v40, %v203_v41  ;;  %v851_v49 = vsel %vm219_vm4, 1.0, %v690_v43  ;;  %vm208_vm8 = vcmp.eq.s32.totalorder %v829_v40, %v164_v59 }
  0x8c   :  { %v839_v46 = vsel %vm221_vm1, 1.0, %v690_v43  ;;  %v533_v62 = vsel %vm208_vm8, 1.0, %v690_v43  ;;  %vm211_vm1 = vcmp.eq.s32.totalorder %v829_v40, %v173_v51 }
  0x8d   :  { %552 = vmatpush.xpose.msk.msra.mxu3 %vm121_vm2, %v839_v46  ;;  %v536_v10 = vsel %vm211_vm1, 1.0, %v690_v43 }
  0x91   :  { %553 = vmatpush.xpose.msk.msra.mxu3 %vm121_vm2, %v845_v47  ;;  %v185_v50 = vpop.permute.xlu1 %184 }
  0x92   :  { %v188_v57 = vpop.permute.xlu0 %187  ;;  %vm215_vm12 = vcmp.eq.s32.totalorder %v829_v40, %v185_v50 }
  0x93   :  { %vm216_vm10 = vcmp.eq.s32.totalorder %v829_v40, %v188_v57  ;;  %v540_v4 = vsel %vm215_vm12, 1.0, %v690_v43  ;;  %v530_v57 = vsel %vm151_vm11, 1.0, %v690_v43 }
  0x94   :  { %v541_v1 = vsel %vm216_vm10, 1.0, %v690_v43 }
  0x95   :  { %554 = vmatpush.xpose.msk.msra.mxu3 %vm121_vm2, %v851_v49 }
  0x99   :  { %555 = vmatpush.xpose.msk.msra.mxu3 %vm121_vm2, %v859_v53  ;;  %v176_v58 = vpop.permute.xlu1 %175 }
  0x9a   :  { %v179_v2 = vpop.permute.xlu0 %178  ;;  %vm212_vm15 = vcmp.eq.s32.totalorder %v829_v40, %v176_v58 }
  0x9b   :  { %vm213_vm14 = vcmp.eq.s32.totalorder %v829_v40, %v179_v2  ;;  %v537_v9 = vsel %vm212_vm15, 1.0, %v690_v43 }
  0x9c   :  { %v538_v6 = vsel %vm213_vm14, 1.0, %v690_v43 }
  0x9d   :  { %556 = vmatpush.xpose.msk.msra.mxu3 %vm121_vm2, %v542_v61 }
  0xa1   :  { %557 = vmatpush.xpose.msk.msra.mxu3 %vm121_vm2, %v541_v1  ;;  %v167_v3 = vpop.permute.xlu1 %166 }
  0xa2   :  { %vm209_vm13 = vcmp.eq.s32.totalorder %v829_v40, %v167_v3  ;;  %v170_v7 = vpop.permute.xlu0 %169 }
  0xa3   :  { %v534_v5 = vsel %vm209_vm13, 1.0, %v690_v43  ;;  %vm210_vm0 = vcmp.eq.s32.totalorder %v829_v40, %v170_v7 }
  0xa4   :  { %v535_v8 = vsel %vm210_vm0, 1.0, %v690_v43 }
  0xa5   :  { %558 = vmatpush.xpose.msk.msra.mxu3 %vm121_vm2, %v540_v4 }
  0xa9   :  { %v90_v48 = vpop.f32.mrf.mxu0  ;;  %559 = vmatpush.xpose.msk.msra.mxu3 %vm121_vm2, %v539_v60 }
  0xaa   :  { %v161_v11 = vpop.permute.xlu0 %160 }
  0xab   :  { %vm207_vm3 = vcmp.eq.s32.totalorder %v829_v40, %v161_v11 }
  0xac   :  { %v532_v12 = vsel %vm207_vm3, 1.0, %v690_v43 }
  0xad   :  { %560 = vmatpush.xpose.msk.msra.mxu3 %vm121_vm2, %v538_v6 }
  0xb1   :  { %v93_v56 = vpop.f32.mrf.mxu0  ;;  %561 = vmatpush.xpose.msk.msra.mxu3 %vm121_vm2, %v537_v9 }
  0xb2   :  { %115 = vmatpush.xpose.msrb.mxu0 %v93_v56  ;;  %584 = vmatpush.msra.mxu1 %v93_v56 }
  0xb3   :  { %585 = vmatpush.msra.mxu2 %v93_v56 }
  0xb4   :  { %586 = vmatpush.msra.mxu1 %v90_v48 }
  0xb5   :  { %587 = vmatpush.msra.mxu2 %v90_v48  ;;  %569 = vmatmul.msk.f32.vlgmr.msra.gmra.mxu1 %vm121_vm2, %v533_v62 }
  0xb6   :  { %575 = vmatmul.msk.f32.vlgmr.msra.gmra.mxu2 %vm121_vm2, %v539_v60  ;;  %116 = vmatpush.xpose.msrb.mxu0 %v90_v48 }
  0xb7   :  { %562 = vmatpush.xpose.msk.msra.mxu3 %vm121_vm2, %v536_v10 }
  0xb9   :  { %117 = vmatmul.f32.vlgmr.msrb.gmra.mxu0 %v98_v63 }
  0xba   :  { %548 = vmatpush.msk.msra.mxu0 %vm152_vm9, %v691_v0 }
  0xbb   :  { %563 = vmatpush.xpose.msk.msra.mxu3 %vm121_vm2, %v535_v8 }
  0xbc   :  { %549 = vmatpush.msk.msra.mxu0 %vm151_vm11, %v691_v0 }
  0xbd   :  { %570 = vmatmul.msk.f32.gmra.mxu1 %vm121_vm2, %v534_v5 }
  0xbe   :  { %402 = vmatpush.msrb.mxu0 %v93_v56  ;;  %576 = vmatmul.msk.f32.gmra.mxu2 %vm121_vm2, %v540_v4 }
  0xbf   :  { %564 = vmatpush.xpose.msk.msra.mxu3 %vm121_vm2, %v534_v5 }
  0xc0   :  { %403 = vmatpush.msrb.mxu0 %v90_v48 }
  0xc3   :  { %565 = vmatpush.xpose.msk.msra.mxu3 %vm121_vm2, %v533_v62  ;;  %v531_v62 = vsel %vm152_vm9, 1.0, %v690_v43 }
  0xc5   :  { %571 = vmatmul.msk.f32.gmra.mxu1 %vm121_vm2, %v535_v8 }
  0xc6   :  { %577 = vmatmul.msk.f32.gmra.mxu2 %vm121_vm2, %v541_v1 }
  0xc7   :  { %566 = vmatpush.xpose.msk.msra.mxu3 %vm121_vm2, %v532_v12 }
  0xcd   :  { %572 = vmatmul.msk.f32.gmra.mxu1 %vm121_vm2, %v536_v10 }
  0xce   :  { %578 = vmatmul.msk.f32.gmra.mxu2 %vm121_vm2, %v542_v61 }
  0xd5   :  { %573 = vmatmul.msk.f32.gmra.mxu1 %vm121_vm2, %v537_v9 }
  0xd6   :  { %579 = vmatmul.msk.f32.gmra.mxu2 %vm121_vm2, %v859_v53 }
  0xdd   :  { %574 = vmatmul.msk.f32.gmra.mxu1 %vm121_vm2, %v538_v6 }
  0xde   :  { %580 = vmatmul.msk.f32.gmra.mxu2 %vm121_vm2, %v851_v49 }
  0xe6   :  { %581 = vmatmul.msk.f32.gmra.mxu2 %vm121_vm2, %v845_v47 }
  0xee   :  { %582 = vmatmul.msk.f32.gmra.mxu2 %vm121_vm2, %v839_v46 }
  0xf6   :  { %583 = vmatmul.msk.f32.gmra.mxu2 %vm121_vm2, %v834_v44 }
 0x132   :  { %v408_v20 = vpop.f32.mrf.mxu1 }
 0x136   :  { %v118_v13 = vpop.f32.mrf.mxu0 }
 0x137   :  { %122 = vst.msk [vmem:[#allocation3] sm:$0xff] %vm121_vm2, %v118_v13 }
 0x139   :  { %v426_v14 = vpop.f32.mrf.mxu2 }
 0x13a   :  { %v411_v22 = vpop.f32.mrf.mxu1 }
 0x13e   :  { %v255_v15 = vld [vmem:[#allocation3] sm:$0xff] }
 0x13f   :  { %550 = vmatmul.msk.f32.vlgmr.msra.gmra.mxu0 %vm121_vm2, %v255_v15  ;;  %567 = vmatmul.msk.f32.vlgmr.msra.gmra.mxu3 %vm121_vm2, %v255_v15 }
 0x141   :  { %v429_v16 = vpop.f32.mrf.mxu2 }
 0x142   :  { %v414_v24 = vpop.f32.mrf.mxu1 }
 0x147   :  { %568 = vmatmul.msk.f32.vlgmr.msrb.gmra.mxu0 %vm121_vm2, %v532_v12  ;;  %vm125_vm2 = vcmask 0  }
 0x148   :  { %126 = vst.msk [vmem:[#allocation5] sm:$0x1] %vm125_vm2, %v692_v30 }
 0x149   :  { %v432_v17 = vpop.f32.mrf.mxu2  ;;  %127 = vst.msk [vmem:[#allocation6] sm:$0x1] %vm125_vm2, %v690_v43 }
 0x14a   :  { %v417_v26 = vpop.f32.mrf.mxu1 }
 0x14f   :  { %v359_v41 = vld [vmem:[#allocation5] sm:$0x1] }
 0x150   :  { %v379_v0 = vld [vmem:[#allocation6] sm:$0x1] }
 0x151   :  { %v435_v18 = vpop.f32.mrf.mxu2 }
 0x152   :  { %v420_v28 = vpop.f32.mrf.mxu1 }
 0x159   :  { %v438_v19 = vpop.f32.mrf.mxu2 }
 0x15a   :  { %v423_v29 = vpop.f32.mrf.mxu1 }
 0x161   :  { %v441_v21 = vpop.f32.mrf.mxu2 }
 0x169   :  { %v444_v23 = vpop.f32.mrf.mxu2 }
 0x171   :  { %v447_v25 = vpop.f32.mrf.mxu2 }
 0x179   :  { %v450_v27 = vpop.f32.mrf.mxu2 }
 0x17a   :  { %466 = vmatpush.msrb.mxu1 %v450_v27 }
 0x17c   :  { %467 = vmatpush.msrb.mxu1 %v447_v25 }
 0x17e   :  { %468 = vmatpush.msrb.mxu1 %v444_v23 }
 0x180   :  { %469 = vmatpush.msrb.mxu1 %v441_v21 }
 0x182   :  { %470 = vmatpush.msrb.mxu1 %v438_v19 }
 0x184   :  { %471 = vmatpush.msrb.mxu1 %v435_v18 }
 0x186   :  { %472 = vmatpush.msrb.mxu1 %v432_v17 }
 0x188   :  { %473 = vmatpush.msrb.mxu1 %v429_v16 }
 0x18a   :  { %474 = vmatpush.msrb.mxu1 %v426_v14 }
 0x18c   :  { %475 = vmatpush.msrb.mxu1 %v423_v29 }
 0x18e   :  { %476 = vmatpush.msrb.mxu1 %v420_v28 }
 0x190   :  { %477 = vmatpush.msrb.mxu1 %v417_v26 }
 0x192   :  { %478 = vmatpush.msrb.mxu1 %v414_v24 }
 0x194   :  { %479 = vmatpush.msrb.mxu1 %v411_v22 }
 0x196   :  { %480 = vmatpush.msrb.mxu1 %v408_v20 }
 0x1bc   :  { %v277_v31 = vpop.f32.mrf.mxu0 }
 0x1c2   :  { %v345_v32 = vpop.f32.mrf.mxu3 }
 0x1c3   :  { %v349_v33 = vrot.slane %v345_v32, 1 }
 0x1c4   :  { %v405_v34 = vpop.f32.mrf.mxu0 }
 0x1c5   :  { %v351_v35 = vadd.f32 %v349_v33, %v277_v31  ;;  %481 = vmatpush.msrb.mxu1 %v405_v34 }
 0x1c7   :  { %v353_v36 = vmul.f32 0.2, %v351_v35  ;;  %vm352_vm4 = vcmp.gt.f32.partialorder %v351_v35, 0.0 }
 0x1c9   :  { %v354_v37 = vsel %vm352_vm4, %v351_v35, %v353_v36 }
 0x1ca   :  { %v360_v38 = vsel %vm358_vm5, %v354_v37, -1e+30 }
 0x1cb   :  { %v362_v39 = vsel %vm361_vm6, %v360_v38, -inf }
 0x1cc   :  { %363 = vmax.xlane.f32.xlu1 %v362_v39 }
 0x23f   :  { %v364_v42 = vpop.xlane.xlu1 %363 }
 0x240   :  { %v365_v44 = vmax.f32 %v359_v41, %v364_v42 }
 0x242   :  { %v366_v45 = vsub.f32 %v359_v41, %v365_v44  ;;  %387 = vst.msk [vmem:[#allocation5] sm:$0x1] %vm125_vm2, %v365_v44  ;;  %371 = vperm.xlu2 %599, %v365_v44  }
 0x244   :  { %v367_v46 = vmul.f32 1.442695, %v366_v45 }
 0x246   :  { %601 = vpow2.f32 %v367_v46 }
 0x24c   :  { %v602_v47 = vpop.eup %601 }
 0x24d   :  { %v456_v48 = vperm.slane %v602_v47, 0  ;;  %v380_v1 = vmul.f32 %v602_v47, %v379_v0 }
 0x24f   :  { %458 = vperm.xlu2 %599, %v456_v48  }
 0x29c   :  { %v372_v49 = vpop.permute.xlu2 %371 }
 0x29d   :  { %v374_v50 = vperm.slane %v372_v49, 0 }
 0x29f   :  { %v375_v51 = vsub.f32 %v354_v37, %v374_v50 }
 0x2a1   :  { %v376_v53 = vmul.f32 1.442695, %v375_v51 }
 0x2a3   :  { %603 = vpow2.f32 %v376_v53 }
 0x2a9   :  { %v604_v56 = vpop.eup %603  ;;  %v459_v6 = vpop.permute.xlu2 %458 }
 0x2aa   :  { %v378_v58 = vsel %vm358_vm5, %v604_v56, 0.0  ;;  %v461_v8 = vmul.f32 0.0, %v459_v6 }
 0x2ab   :  { %v381_v59 = vsel %vm361_vm6, %v378_v58, 0.0  ;;  %v463_v60 = vperm.slane %v378_v58, 0 }
 0x2ac   :  { %382 = vadd.xlane.f32.xlu0 %v381_v59 }
 0x2ad   :  { %v464_v61 = vmul.f32 %v530_v57, %v463_v60  ;;  %v465_v63 = vmul.f32 %v531_v62, %v463_v60 }
 0x2af   :  { %482 = vmatmul.f32.vlgmr.msrb.gmra.mxu1 %v464_v61 }
 0x2b7   :  { %485 = vmatmul.f32.gmra.mxu1 %v465_v63 }
 0x31f   :  { %v383_v52 = vpop.xlane.xlu0 %382 }
 0x320   :  { %v384_v2 = vadd.f32 %v383_v52, %v380_v1 }
 0x322   :  { %386 = vst.msk [vmem:[#allocation6] sm:$0x1] %vm125_vm2, %v384_v2 }
 0x329   :  { %v496_v40 = vld [vmem:[#allocation6] sm:$0x1] }
 0x32a   :  { %605 = vrcp.f32 %v496_v40 }
 0x32c   :  { %v483_v5 = vpop.f32.mrf.mxu1 }
 0x32d   :  { %v489_v9 = vadd.f32 %v483_v5, %v461_v8 }
 0x330   :  { %v606_v3 = vpop.eup %605 }
 0x331   :  { %v501_v4 = vperm.slane %v606_v3, 0 }
 0x333   :  { %503 = vperm.xlu2 %599, %v501_v4  }
 0x334   :  { %v486_v7 = vpop.f32.mrf.mxu1 }
 0x335   :  { %v490_v54 = vadd.f32 %v486_v7, %v461_v8 }
 0x38d   :  { %v504_v43 = vpop.permute.xlu2 %503 }
 0x38e   :  { %v506_v55 = vmul.f32 %v504_v43, %v489_v9  ;;  %v507_v10 = vmul.f32 %v504_v43, %v490_v54 }
 0x390   :  { %508 = vst [vmem:[#allocation12] sm:$0xff] %v506_v55 }
 0x391   :  { %509 = vst [vmem:[#allocation12 + $0x8] sm:$0xff] %v507_v10 }
 0x392   :  { %522 = dma.vmem_to_hbm [thread:$0]  %s515_s17, 256, %s517_s20, [#allocation9], %s686_s26, %s686_s26, %s687_s27  }
 0x393   :  { %683 = dma.done.wait [#allocation9], 256  }
 0x394   :  { %684 = vsyncadd [#allocation9], 4294967040 }
 0x395   :  { %527 = vsyncpa [#allocation8], 1 }
 0x396   :  { %528 = vsyncpa [#allocation11], 1 }
 0x397   :  { %529 = vsyncpa [#allocation9], 1 }

</bundles_post_ra>
